<compile_context>
chip_gen: v6e
topology: v6e:2x2x1
jax: 0.10.0
libtpu: 0.0.40
codegen_flags: <defaults>
</compile_context>

<pallas_src>
import functools

import jax
import jax.numpy as jnp
import numpy as np
from jax.experimental import pallas as pl
from jax.experimental.pallas import tpu as pltpu

BN_EPS = 1e-5


def _round_up(n, m):
    return ((n + m - 1) // m) * m


def _mlp_kernel(x_ref, p12_ref, p3_ref, o_ref, *, fin, h1, h2):
    """Fused 3-layer MLP on one batch tile. BN already folded into W2/b2, W3/b3."""
    x = x_ref[...]

    # Static slices into the packed parameter slabs (all sublane-aligned starts).
    w1 = p12_ref[0:fin, :h1]                              # (fin, h1)
    w2 = p12_ref[fin:fin + h1, :h2]                       # (h1, h2)   (BN1 folded in)
    b1 = p12_ref[fin + h1:fin + h1 + 1, :h1]              # (1, h1)    row 48 (8-aligned)
    b2 = p12_ref[fin + h1 + 8:fin + h1 + 9, :h2]          # (1, h2)    row 56 (8-aligned)
    w3 = p3_ref[0:h2, :]                                  # (h2, fout) (BN2 folded in)
    b3 = p3_ref[h2:h2 + 1, :]                             # (1, fout)  row 32 (8-aligned)

    # Layer 1: Linear -> ReLU   (BatchNorm1d folded into next layer, eval-Dropout = id)
    h = jnp.dot(x, w1, preferred_element_type=jnp.float32) + b1
    h = jnp.maximum(h, 0.0)

    # Layer 2: Linear (BN1-folded) -> Tanh
    h = jnp.dot(h.astype(w2.dtype), w2, preferred_element_type=jnp.float32) + b2
    h = jnp.tanh(h)

    # Output layer: Linear (BN2-folded) -> Sigmoid, narrow (tile_b, fout) store.
    h = jnp.dot(h.astype(w3.dtype), w3, preferred_element_type=jnp.float32) + b3
    o_ref[...] = jax.nn.sigmoid(h).astype(o_ref.dtype)


def fold_and_pack_params(params, compute_dtype=jnp.float32):
    """Fold running-stat BatchNorms into the following Linear and pack into 2 slabs."""
    (w1, b1, g1, be1, rm1, rv1,
     w2, b2, g2, be2, rm2, rv2,
     w3, b3) = params

    # BN(y) = y * a + c   with  a = g * rsqrt(rv + eps),  c = be - rm * a   (exact, f32)
    a1 = g1 * jax.lax.rsqrt(rv1 + BN_EPS)
    c1 = be1 - rm1 * a1
    w2f = w2 * a1.reshape(-1, 1)
    b2f = b2 + c1 @ w2

    a2 = g2 * jax.lax.rsqrt(rv2 + BN_EPS)
    c2 = be2 - rm2 * a2
    w3f = w3 * a2.reshape(-1, 1)
    b3f = b3 + c2 @ w3

    fin, h1 = w1.shape
    h2, fout = w3f.shape
    hw = max(h1, h2)

    def pad_cols(a):
        return a if a.shape[1] == hw else jnp.pad(a, ((0, 0), (0, hw - a.shape[1])))

    # Slab A: [W1; W2'; b1-block(8 rows); b2'-block(8 rows)], biases 8-sublane aligned.
    bias_blk1 = jnp.zeros((8, h1), jnp.float32).at[0:1, :].set(b1)
    bias_blk2 = jnp.zeros((8, h2), jnp.float32).at[0:1, :].set(b2f)
    slab12 = jnp.concatenate(
        [pad_cols(w1), pad_cols(w2f), pad_cols(bias_blk1), pad_cols(bias_blk2)],
        axis=0).astype(compute_dtype)

    # Slab B: [W3'; b3'] at the true output width (no 128-lane padding).
    slab3 = jnp.concatenate([w3f, b3f], axis=0).astype(compute_dtype)

    return slab12, slab3, (fin, h1, h2, fout)


def _choose_tiling(batch, max_tile_b):
    """Pick (tile_b, grid): tile_b % 8 == 0, tile_b <= max_tile_b, and once batch > 8
    an even grid (>= 2 steps) so both v7x TensorCores get whole steps, while keeping
    padded-row waste small for awkward batch sizes."""
    if batch <= 8:
        return 8, 1
    grid = max(2, pl.cdiv(batch, max_tile_b))
    if grid % 2:
        grid += 1
    tile_b = _round_up(pl.cdiv(batch, grid), 8)
    return tile_b, grid


def make_forward_fn(params, *, compute_dtype=jnp.float32, max_tile_b=512):
    """Fold + pack params once (hoisted), return a jitted fused forward: x -> (B, fout)."""
    slab12, slab3, (fin, h1, h2, fout) = fold_and_pack_params(params, compute_dtype)
    kernel = functools.partial(_mlp_kernel, fin=fin, h1=h1, h2=h2)
    itemsize = jnp.dtype(compute_dtype).itemsize

    @jax.jit
    def forward(x):
        batch = x.shape[0]
        tile_b, grid_n = _choose_tiling(batch, max_tile_b)
        b_pad = tile_b * grid_n
        if b_pad != batch:
            x_p = jnp.pad(x, ((0, b_pad - batch), (0, 0)))
        else:
            x_p = x
        x_p = x_p.astype(compute_dtype)

        cost = pl.CostEstimate(
            flops=2 * b_pad * (fin * h1 + h1 * h2 + h2 * fout),
            transcendentals=b_pad * (h2 + fout),                 # tanh + sigmoid(exp)
            bytes_accessed=(x_p.size + slab12.size + slab3.size) * itemsize
            + b_pad * fout * 4,
        )

        out = pl.pallas_call(
            kernel,
            out_shape=jax.ShapeDtypeStruct((b_pad, fout), jnp.float32),
            grid=(grid_n,),
            in_specs=[
                pl.BlockSpec((tile_b, fin), lambda i: (i, 0)),    # activations: batch-tiled
                pl.BlockSpec(slab12.shape, lambda i: (0, 0)),     # params: VMEM-resident
                pl.BlockSpec(slab3.shape, lambda i: (0, 0)),
            ],
            out_specs=pl.BlockSpec((tile_b, fout), lambda i: (i, 0)),
            compiler_params=pltpu.CompilerParams(
                dimension_semantics=("parallel",)),               # shard batch across TCs
            cost_estimate=cost,
        )(x_p, slab12, slab3)

        return out[:batch] if b_pad != batch else out

    return forward


def make_params(key, layers):
    """Deterministic parameter init. Linear weights are (in, out) = torch weight.T."""
    keys = jax.random.split(key, 8)
    f0, f1, f2, f3 = layers

    def lin(kw, kb, fin, fout_):
        bound = 1.0 / np.sqrt(fin)
        w = jax.random.uniform(kw, (fin, fout_), jnp.float32, -bound, bound)
        b = jax.random.uniform(kb, (1, fout_), jnp.float32, -bound, bound)
        return w, b

    w1, b1 = lin(keys[0], keys[1], f0, f1)
    w2, b2 = lin(keys[2], keys[3], f1, f2)
    w3, b3 = lin(keys[4], keys[5], f2, f3)

    # BatchNorm1d params / running stats (non-trivial deterministic values).
    g1 = 1.0 + 0.1 * jax.random.normal(keys[6], (1, f1), jnp.float32)
    be1 = 0.05 * jnp.arange(f1, dtype=jnp.float32).reshape(1, f1)
    rm1 = 0.02 * jnp.arange(f1, dtype=jnp.float32).reshape(1, f1) - 0.3
    rv1 = 0.5 + 0.01 * jnp.arange(f1, dtype=jnp.float32).reshape(1, f1)

    g2 = 1.0 + 0.1 * jax.random.normal(keys[7], (1, f2), jnp.float32)
    be2 = -0.03 * jnp.arange(f2, dtype=jnp.float32).reshape(1, f2)
    rm2 = 0.1 * jnp.sin(jnp.arange(f2, dtype=jnp.float32)).reshape(1, f2)
    rv2 = 0.8 + 0.02 * jnp.arange(f2, dtype=jnp.float32).reshape(1, f2)

    return (w1, b1, g1, be1, rm1, rv1,
            w2, b2, g2, be2, rm2, rv2,
            w3, b3)


def reference_forward(x, params):
    """Un-folded reference (explicit BN with running stats), matches the PyTorch eval path."""
    (w1, b1, g1, be1, rm1, rv1,
     w2, b2, g2, be2, rm2, rv2,
     w3, b3) = params
    h = x @ w1 + b1
    h = jnp.maximum(h, 0.0)
    h = (h - rm1) / jnp.sqrt(rv1 + BN_EPS) * g1 + be1
    h = h @ w2 + b2
    h = jnp.tanh(h)
    h = (h - rm2) / jnp.sqrt(rv2 + BN_EPS) * g2 + be2
    h = h @ w3 + b3
    return jax.nn.sigmoid(h)


if __name__ == "__main__":
    # NeuralNet(layers=[16, 32, 32, 8], dropoutRates=[0.1, 0.1], l2Reg=0.0,
    #           inputActivation='relu', hiddenActivation='tanh',
    #           outputActivation='sigmoid')
    layers = (16, 32, 32, 8)

    key = jax.random.PRNGKey(0)
    kx, kp = jax.random.split(key)
    params = make_params(kp, layers)

    # Fold/pack once, jitted forward (f32 compute for a tight reference check).
    forward = make_forward_fn(params)

    # Small example batch (BN applied since batch > 1).
    batch = 8
    x = jax.random.normal(kx, (batch, layers[0]), jnp.float32)
    out = jax.block_until_ready(forward(x))
    ref = reference_forward(x, params)
    assert out.shape == (batch, layers[-1])
    np.testing.assert_allclose(np.asarray(out), np.asarray(ref), rtol=1e-5, atol=1e-5)

    # Larger, non-multiple batch: exercises the even-grid (v7x) + padding path
    # (batch=300 -> tile_b=152, grid=2, only 4 padded rows).
    xb = jax.random.normal(kx, (300, layers[0]), jnp.float32)
    outb = jax.block_until_ready(forward(xb))
    refb = reference_forward(xb, params)
    assert outb.shape == (300, layers[-1])
    np.testing.assert_allclose(np.asarray(outb), np.asarray(refb), rtol=1e-5, atol=1e-5)

    # bf16 MXU-operand path (f32 accumulation + f32 epilogue), loosened tolerance.
    forward_bf16 = make_forward_fn(params, compute_dtype=jnp.bfloat16)
    outbf = jax.block_until_ready(forward_bf16(xb))
    assert outbf.shape == (300, layers[-1])
    np.testing.assert_allclose(np.asarray(outbf), np.asarray(refb), rtol=3e-2, atol=3e-2)

    print("KERNEL_OK")
</pallas_src>

<mosaic_0001>
module attributes {stable_mosaic.version = 11 : i64} {
  func.func @_mlp_kernel(%arg0: i32, %arg1: memref<8x16xf32, #tpu.memory_space<vmem>>, %arg2: memref<64x32xf32, #tpu.memory_space<vmem>>, %arg3: memref<33x8xf32, #tpu.memory_space<vmem>>, %arg4: memref<8x8xf32, #tpu.memory_space<vmem>>) attributes {dimension_semantics = [#tpu.dimension_semantics<parallel>], iteration_bounds = array<i64: 1>, scalar_prefetch = 0 : i64, scratch_operands = 0 : i64, tpu.core_type = #tpu.core_type<tc>, window_params = [{transform_indices = @transform_0, window_bounds = array<i64: 8, 16>}, {pipeline_mode = #tpu.pipeline_mode<synchronous>, transform_indices = @transform_1, window_bounds = array<i64: 64, 32>}, {pipeline_mode = #tpu.pipeline_mode<synchronous>, transform_indices = @transform_2, window_bounds = array<i64: 33, 8>}, {transform_indices = @transform_3, window_bounds = array<i64: 8, 8>}]} {
    %c0 = arith.constant 0 : index
    %c0_0 = arith.constant 0 : index
    %0 = vector.load %arg1[%c0, %c0_0] : memref<8x16xf32, #tpu.memory_space<vmem>>, vector<8x16xf32>
    %c0_1 = arith.constant 0 : index
    %c0_2 = arith.constant 0 : index
    %1 = vector.load %arg2[%c0_1, %c0_2] : memref<64x32xf32, #tpu.memory_space<vmem>>, vector<16x32xf32>
    %c16 = arith.constant 16 : index
    %c0_3 = arith.constant 0 : index
    %2 = vector.load %arg2[%c16, %c0_3] : memref<64x32xf32, #tpu.memory_space<vmem>>, vector<32x32xf32>
    %c48 = arith.constant 48 : index
    %c0_4 = arith.constant 0 : index
    %3 = vector.load %arg2[%c48, %c0_4] : memref<64x32xf32, #tpu.memory_space<vmem>>, vector<1x32xf32>
    %c56 = arith.constant 56 : index
    %c0_5 = arith.constant 0 : index
    %4 = vector.load %arg2[%c56, %c0_5] : memref<64x32xf32, #tpu.memory_space<vmem>>, vector<1x32xf32>
    %c0_6 = arith.constant 0 : index
    %c0_7 = arith.constant 0 : index
    %5 = vector.load %arg3[%c0_6, %c0_7] : memref<33x8xf32, #tpu.memory_space<vmem>>, vector<32x8xf32>
    %c32 = arith.constant 32 : index
    %c0_8 = arith.constant 0 : index
    %6 = vector.load %arg3[%c32, %c0_8] : memref<33x8xf32, #tpu.memory_space<vmem>>, vector<1x8xf32>
    %cst = arith.constant dense<0.000000e+00> : vector<8x32xf32>
    %7 = tpu.matmul %0, %1, %cst {dimension_numbers = #tpu.dot_dimension_numbers<[1], [0], [0], [1], [0, 0, 1, 1], [], []>} : vector<8x16xf32>, vector<16x32xf32>, vector<8x32xf32> -> vector<8x32xf32>
    %8 = vector.broadcast %3 : vector<1x32xf32> to vector<8x32xf32>
    %9 = arith.addf %7, %8 : vector<8x32xf32>
    %cst_9 = arith.constant 0.000000e+00 : f32
    %10 = vector.broadcast %cst_9 : f32 to vector<8x32xf32>
    %11 = arith.maximumf %9, %10 : vector<8x32xf32>
    %cst_10 = arith.constant dense<0.000000e+00> : vector<8x32xf32>
    %12 = tpu.matmul %11, %2, %cst_10 {dimension_numbers = #tpu.dot_dimension_numbers<[1], [0], [0], [1], [0, 0, 1, 1], [], []>} : vector<8x32xf32>, vector<32x32xf32>, vector<8x32xf32> -> vector<8x32xf32>
    %13 = vector.broadcast %4 : vector<1x32xf32> to vector<8x32xf32>
    %14 = arith.addf %12, %13 : vector<8x32xf32>
    %15 = math.tanh %14 : vector<8x32xf32>
    %cst_11 = arith.constant dense<0.000000e+00> : vector<8x8xf32>
    %16 = tpu.matmul %15, %5, %cst_11 {dimension_numbers = #tpu.dot_dimension_numbers<[1], [0], [0], [1], [0, 0, 1, 1], [], []>} : vector<8x32xf32>, vector<32x8xf32>, vector<8x8xf32> -> vector<8x8xf32>
    %17 = vector.broadcast %6 : vector<1x8xf32> to vector<8x8xf32>
    %18 = arith.addf %16, %17 : vector<8x8xf32>
    %19 = arith.negf %18 : vector<8x8xf32>
    %20 = math.exp %19 : vector<8x8xf32>
    %cst_12 = arith.constant 1.000000e+00 : f32
    %21 = vector.broadcast %cst_12 : f32 to vector<8x8xf32>
    %22 = arith.addf %21, %20 : vector<8x8xf32>
    %23 = arith.divf %21, %22 : vector<8x8xf32>
    %c0_13 = arith.constant 0 : index
    %c0_14 = arith.constant 0 : index
    %24 = vector.load %arg4[%c0_13, %c0_14] : memref<8x8xf32, #tpu.memory_space<vmem>>, vector<8x8xf32>
    tpu.vector_store %arg4[%c0_13, %c0_14], %23 {strides = array<i32>} : memref<8x8xf32, #tpu.memory_space<vmem>>, vector<8x8xf32>,
    return
  }
  func.func @transform_0(%arg0: i32) -> (i32, i32) {
    %c0_i32 = arith.constant 0 : i32
    %c0_i32_0 = arith.constant 0 : i32
    return %arg0, %c0_i32 : i32, i32
  }
  func.func @transform_1(%arg0: i32) -> (i32, i32) {
    %c0_i32 = arith.constant 0 : i32
    %c0_i32_0 = arith.constant 0 : i32
    %c0_i32_1 = arith.constant 0 : i32
    return %c0_i32, %c0_i32_0 : i32, i32
  }
  func.func @transform_2(%arg0: i32) -> (i32, i32) {
    %c0_i32 = arith.constant 0 : i32
    %c0_i32_0 = arith.constant 0 : i32
    %c0_i32_1 = arith.constant 0 : i32
    return %c0_i32, %c0_i32_0 : i32, i32
  }
  func.func @transform_3(%arg0: i32) -> (i32, i32) {
    %c0_i32 = arith.constant 0 : i32
    %c0_i32_0 = arith.constant 0 : i32
    return %arg0, %c0_i32 : i32, i32
  }
}

</mosaic_0001>

<bundles_post_ra>
// kernel: forward.1
= control target key start
LH: loop header
LB: loop body
LE: loop exit
PB: predicated region body
PF: predicated region fallthrough
CT: control target
= control target key end

     0   :  { %8 = vsyncpa [#allocation3], 0  ;;  %s521_s0 = inlined_call_operand.hbm [shape: f32[8,16], index: 0, kind: input, shape index: {}]   ;;  %s522_s1 = inlined_call_operand.hbm [shape: f32[64,32], index: 1, kind: input, shape index: {}]   ;;  %s523_s2 = inlined_call_operand.hbm [shape: f32[33,8], index: 2, kind: input, shape index: {}]   ;;  %s524_s3 = inlined_call_operand.hbm [shape: f32[8,8], index: 3, kind: output, shape index: {}]  }
   0x1   :  { %9 = vsyncpa [#allocation6], 0 }
   0x2   :  { %10 = vsyncpa [#allocation4], 0  ;;  %s476_s12 = smov [#allocation5]  }
   0x3   :  { %s26_s13 = sshll.u32 %s476_s12, 4  ;;  %s27_s13 = int_to_ptr.vmem [resolvable:$true] %s26_s13 }
   0x4   :  { %s398_s14 = scalar_lea.vmem %s27_s13, 1024  ;;  %p403_p1 = scmp.lt.s32.totalorder %s27_s13, %s27_s13 }
   0x5   :  { %p399_p0 = scmp.ne.s32.totalorder %s27_s13, %s398_s14  ;;  %p404_p2 = scmp.lt.s32.totalorder %s398_s14, %s398_s14 }
   0x7   :  { %p405_p3 = por %p404_p2, %p403_p1 }
   0x9   :  { %p406_p4 = pnand %p405_p3, %p399_p0 }
   0xb   :  { %409 = shalt.err (!%p406_p4)
}
   0xc   :  { %s477_s15 = smov 128   ;;  %s478_s16 = smov 8  }
   0xd   :  { %32 = dma.hbm_to_vmem [thread:$0]  %s522_s1, 1024, %s27_s13, [#allocation6], %s477_s15, %s477_s15, %s478_s16  }
   0xe   :  { %s479_s19 = smov [#allocation2]   ;;  %s480_s21 = smov [#allocation7]  }
   0xf   :  { %s17_s20 = sshll.u32 %s479_s19, 4  ;;  %s38_s22 = sshll.u32 %s480_s21, 4  ;;  %s18_s20 = int_to_ptr.vmem [resolvable:$true] %s17_s20  ;;  %s39_s22 = int_to_ptr.vmem [resolvable:$true] %s38_s22 }
  0x10   :  { %s418_s23 = scalar_lea.vmem %s18_s20, 128  ;;  %p423_p6 = scmp.lt.s32.totalorder %s18_s20, %s18_s20 }
  0x11   :  { %p419_p5 = scmp.ne.s32.totalorder %s18_s20, %s418_s23  ;;  %p424_p7 = scmp.lt.s32.totalorder %s418_s23, %s418_s23 }
  0x13   :  { %p425_p8 = por %p424_p7, %p423_p6 }
  0x15   :  { %p426_p9 = pnand %p425_p8, %p419_p5 }
  0x17   :  { %429 = shalt.err (!%p426_p9)
}
  0x18   :  { %20 = dma.hbm_to_vmem [thread:$0]  %s521_s0, 128, %s18_s20, [#allocation3]  }
  0x19   :  { %s438_s26 = scalar_lea.vmem %s39_s22, 640  ;;  %p443_p11 = scmp.lt.s32.totalorder %s39_s22, %s39_s22 }
  0x1a   :  { %p439_p10 = scmp.ne.s32.totalorder %s39_s22, %s438_s26  ;;  %p444_p12 = scmp.lt.s32.totalorder %s438_s26, %s438_s26 }
  0x1c   :  { %p445_p13 = por %p444_p12, %p443_p11 }
  0x1e   :  { %p446_p0 = pnand %p445_p13, %p439_p10 }
  0x20   :  { %449 = shalt.err (!%p446_p0)
}
  0x21   :  { %44 = dma.hbm_to_vmem [thread:$0]  %s523_s2, 640, %s39_s22, [#allocation6], %s477_s15, %s477_s15, %s478_s16  }
  0x22   :  { %470 = dma.done.wait [#allocation3], 128  }
  0x23   :  { %471 = vsyncadd [#allocation3], 4294967168 }
  0x24   :  { %472 = dma.done.wait [#allocation6], 1664  }
  0x25   :  { %473 = vsyncadd [#allocation6], 4294965632  ;;  %v481_v0 = vmov 0.0   ;;  %vm482_vm0 = vmmov 0   ;;  %v56_v1 = vld [vmem:[#allocation5 + $0x8] sm:$0xff]  ;;  %v55_v2 = vld [vmem:[#allocation5] sm:$0xff] }
  0x26   :  { %347 = vmatprep.subr.mxu0 %v481_v0  ;;  %351 = vmatprep.mubr.msk.f32.mxu0 %vm482_vm0, %v481_v0  ;;  %v54_v3 = vld [vmem:[#allocation2] sm:$0xff]  ;;  %vm72_vm1 = vcmask 130048   ;;  %v60_v4 = vld [vmem:[#allocation5 + $0x28] sm:$0xff]  ;;  %v59_v5 = vld [vmem:[#allocation5 + $0x20] sm:$0xff]  ;;  %vm151_vm2 = vcmask 261120   ;;  %s483_s0 = smov [#allocation8]  }
  0x27   :  { %354 = vmatprep.subr.mxu1 %v481_v0  ;;  %362 = vmatprep.mubr.msk.f32.mxu1 %vm482_vm0, %v481_v0  ;;  %v58_v6 = vld [vmem:[#allocation5 + $0x18] sm:$0xff]  ;;  %v57_v7 = vld [vmem:[#allocation5 + $0x10] sm:$0xff]  ;;  %v64_v15 = vld [vmem:[#allocation7 + $0x8] sm:$0xff]  ;;  %s317_s2 = sshll.u32 %s483_s0, 4  ;;  %vm309_vm3 = vcmask 64512   ;;  %s318_s2 = int_to_ptr.vmem [resolvable:$true] %s317_s2 }
  0x28   :  { %348 = vmatpush3.msra.mxu0 %v56_v1  ;;  %355 = vmatpush3.msra.mxu1 %v60_v4  ;;  %v327_v8 = vld [vmem:[#allocation5 + $0x30] ss:$0 sm:$0xff]  ;;  %v66_v13 = vld [vmem:[#allocation7 + $0x18] sm:$0xff]  ;;  %v63_v16 = vld [vmem:[#allocation7] sm:$0xff]  ;;  %s450_s28 = scalar_lea.vmem %s318_s2, 128  ;;  %p455_p2 = scmp.lt.s32.totalorder %s318_s2, %s318_s2 }
  0x29   :  { %349 = vmatprep.subr.mxu0 %v481_v0  ;;  %356 = vmatprep.subr.mxu1 %v481_v0  ;;  %v65_v14 = vld [vmem:[#allocation7 + $0x10] sm:$0xff]  ;;  %v329_v17 = vld [vmem:[#allocation5 + $0x38] ss:$0 sm:$0xff]  ;;  %v331_v22 = vld [vmem:[#allocation7 + $0x20] ss:$0 sm:$0xff]  ;;  %p451_p1 = scmp.ne.s32.totalorder %s318_s2, %s450_s28  ;;  %p456_p3 = scmp.lt.s32.totalorder %s450_s28, %s450_s28 }
  0x2a   :  { %350 = vmatpush3.msra.mxu0 %v55_v2  ;;  %357 = vmatpush3.msra.mxu1 %v59_v5 }
  0x2b   :  { %352 = vmatmul.mubr.msk.f32.vlgmr.msra.gmra.mxu0 %vm72_vm1, %v54_v3  ;;  %365 = vmatprep.subr.mxu0 %v481_v0  ;;  %p457_p4 = por %p456_p3, %p455_p2 }
  0x2c   :  { %373 = vmatprep.mubr.msk.f32.mxu0 %vm482_vm0, %v481_v0  ;;  %358 = vmatprep.subr.mxu1 %v481_v0 }
  0x2d   :  { %359 = vmatpush3.msra.mxu1 %v58_v6  ;;  %366 = vmatpush3.msra.mxu0 %v66_v13  ;;  %p458_p5 = pnand %p457_p4, %p451_p1 }
  0x2e   :  { %360 = vmatprep.subr.mxu1 %v481_v0  ;;  %367 = vmatprep.subr.mxu0 %v481_v0 }
  0x2f   :  { %361 = vmatpush3.msra.mxu1 %v57_v7  ;;  %368 = vmatpush3.msra.mxu0 %v65_v14 }
  0x30   :  { %369 = vmatprep.subr.mxu0 %v481_v0 }
  0x31   :  { %370 = vmatpush3.msra.mxu0 %v64_v15 }
  0x32   :  { %371 = vmatprep.subr.mxu0 %v481_v0 }
  0x33   :  { %372 = vmatpush3.msra.mxu0 %v63_v16 }
  0xeb   :  { %v142_v9 = vpop.f32.mrf.mxu0 }
  0xec   :  { %v143_v10 = vadd.f32 %v327_v8, %v142_v9 }
  0xed   :  { %v353_v11 = vpop.f32.mrf.mxu0 }
  0xee   :  { %v146_v12 = vmax.f32 %v143_v10, 0.0 }
  0xf0   :  { %363 = vmatmul.mubr.msk.f32.vlgmr.msra.gmra.mxu1 %vm151_vm2, %v146_v12 }
 0x1b0   :  { %v221_v18 = vpop.f32.mrf.mxu1 }
 0x1b1   :  { %v222_v19 = vadd.f32 %v329_v17, %v221_v18 }
 0x1b2   :  { %v364_v20 = vpop.f32.mrf.mxu1 }
 0x1b3   :  { %384 = vtanh.f32 %v222_v19 }
 0x1c0   :  { %v385_v21 = vpop.eup %384 }
 0x1c1   :  { %374 = vmatmul.mubr.msk.f32.vlgmr.msra.gmra.mxu0 %vm151_vm2, %v385_v21 }
 0x281   :  { %v299_v23 = vpop.f32.mrf.mxu0 }
 0x282   :  { %v300_v24 = vadd.f32 %v331_v22, %v299_v23 }
 0x283   :  { %v375_v25 = vpop.f32.mrf.mxu0 }
 0x284   :  { %v333_v26 = vmul.f32 -1.442695, %v300_v24 }
 0x286   :  { %386 = vpow2.f32 %v333_v26 }
 0x293   :  { %v387_v27 = vpop.eup %386 }
 0x294   :  { %v306_v28 = vadd.f32 1.0, %v387_v27 }
 0x296   :  { %388 = vrcp.f32 %v306_v28 }
 0x2a3   :  { %v389_v29 = vpop.eup %388 }
 0x2a4   :  { %310 = vst.msk [vmem:[#allocation8] sm:$0xff] %vm309_vm3, %v389_v29 }
 0x2a5   :  { %461 = shalt.err (!%p458_p5)
}
 0x2a6   :  { %320 = dma.vmem_to_hbm [thread:$0]  %s318_s2, 128, %s524_s3, [#allocation4]  }
 0x2a7   :  { %474 = dma.done.wait [#allocation4], 128  }
 0x2a8   :  { %475 = vsyncadd [#allocation4], 4294967168 }
 0x2a9   :  { %324 = vsyncpa [#allocation3], 1 }
 0x2aa   :  { %325 = vsyncpa [#allocation6], 1 }
 0x2ab   :  { %326 = vsyncpa [#allocation4], 1 }

</bundles_post_ra>
